<compile_context>
chip_gen: v5e
topology: v5e:2x2
jax: 0.10.0
libtpu: 0.0.40
codegen_flags: <defaults>
</compile_context>

<pallas_src>
import jax
import jax.numpy as jnp
from jax.experimental import pallas as pl
from jax.experimental.pallas import tpu as pltpu

LANES = 128
SLAB_ROWS = 8            # one f32 vreg-row of work per slab iteration
ROW_ALIGN = 32           # block granularity; also satisfies (16,128)/(32,128) min tiles
MAX_BLOCK_ROWS = 4096    # 4096*128*4B = 2 MiB per f32 input block
SMOOTH = 1.0


def _make_kernel(num_slabs):
    unroll = min(8, num_slabs)

    def kernel(o_ref, t_ref, sums_ref, acc_ref):
        # acc_ref (VMEM, (4, 8, 128) f32): per-lane partial sums of
        #   [0] o*t (dice intersection), [1] o, [2] t, [3] per-element BCE
        # sums_ref (SMEM, (4,) f32): written only on the final grid step.
        i = pl.program_id(0)

        @pl.when(i == 0)
        def _():
            acc_ref[...] = jnp.zeros_like(acc_ref)

        zero = jnp.zeros((SLAB_ROWS, LANES), jnp.float32)

        def slab_body(g, carry):
            acc_ot, acc_o, acc_t, acc_bce = carry
            r0 = pl.multiple_of(g * SLAB_ROWS, SLAB_ROWS)
            o = o_ref[pl.ds(r0, SLAB_ROWS), :].astype(jnp.float32)
            t = t_ref[pl.ds(r0, SLAB_ROWS), :].astype(jnp.float32)
            # PyTorch's BCELoss clamps each log term at -100; this also makes
            # zero-padded elements (o=0, t=0) contribute exactly 0.
            log_o = jnp.maximum(jnp.log(o), jnp.float32(-100.0))
            log_1mo = jnp.maximum(jnp.log(1.0 - o), jnp.float32(-100.0))
            # == -(t*log_o + (1-t)*log_1mo), restructured to save VPU ops.
            bce = t * (log_1mo - log_o) - log_1mo
            return (acc_ot + o * t, acc_o + o, acc_t + t, acc_bce + bce)

        acc_ot, acc_o, acc_t, acc_bce = jax.lax.fori_loop(
            0, num_slabs, slab_body, (zero, zero, zero, zero), unroll=unroll)

        acc_ref[0] += acc_ot
        acc_ref[1] += acc_o
        acc_ref[2] += acc_t
        acc_ref[3] += acc_bce

        @pl.when(i == pl.num_programs(0) - 1)
        def _():
            # Single deferred cross-lane reduce (XLU) at the very end.
            sums_ref[0] = jnp.sum(acc_ref[0])
            sums_ref[1] = jnp.sum(acc_ref[1])
            sums_ref[2] = jnp.sum(acc_ref[2])
            sums_ref[3] = jnp.sum(acc_ref[3])

    return kernel


def _round_up(x, m):
    return ((x + m - 1) // m) * m


def mixed_loss(output, target):
    """MixedLoss.forward: dice(output, target) + bce(output, target.squeeze())."""
    o_flat = output.reshape(-1)
    t_flat = target.reshape(-1)
    n = o_flat.shape[0]
    assert t_flat.shape[0] == n, "output and target must have the same element count"

    # Host-side geometry: pad (in native dtype, with zeros) up to an exact grid
    # multiple so the kernel never needs a ragged-block mask.  Zero padding
    # contributes 0 to every accumulated sum (see the -100 clamp in the kernel).
    rows_min = pl.cdiv(n, LANES)
    rows_aligned = _round_up(rows_min, ROW_ALIGN)
    grid = pl.cdiv(rows_aligned, MAX_BLOCK_ROWS)
    block_rows = _round_up(pl.cdiv(rows_aligned, grid), ROW_ALIGN)
    rows_total = grid * block_rows
    n_pad = rows_total * LANES

    pad = n_pad - n
    if pad:
        o_flat = jnp.pad(o_flat, (0, pad))
        t_flat = jnp.pad(t_flat, (0, pad))

    o2 = o_flat.reshape(rows_total, LANES)
    t2 = t_flat.reshape(rows_total, LANES)

    num_slabs = block_rows // SLAB_ROWS
    kernel = _make_kernel(num_slabs)

    # Explicit VMEM budget: 2 streams x 2 pipeline buffers x block bytes,
    # plus the (4,8,128) f32 accumulator and headroom for compiler temps.
    block_bytes = block_rows * LANES * (o2.dtype.itemsize + t2.dtype.itemsize)
    vmem_limit = 2 * block_bytes + 4 * SLAB_ROWS * LANES * 4 + (4 << 20)
    vmem_limit = min(vmem_limit, 32 * 1024 * 1024)

    sums = pl.pallas_call(
        kernel,
        out_shape=jax.ShapeDtypeStruct((4,), jnp.float32),
        grid_spec=pltpu.PrefetchScalarGridSpec(
            num_scalar_prefetch=0,
            grid=(grid,),
            in_specs=[
                pl.BlockSpec((block_rows, LANES), lambda i: (i, 0)),
                pl.BlockSpec((block_rows, LANES), lambda i: (i, 0)),
            ],
            out_specs=pl.BlockSpec(memory_space=pltpu.SMEM),
            scratch_shapes=[pltpu.VMEM((4, SLAB_ROWS, LANES), jnp.float32)],
        ),
        compiler_params=pltpu.CompilerParams(
            dimension_semantics=("arbitrary",),   # sequential: accumulator across grid
            vmem_limit_bytes=vmem_limit,
        ),
    )(o2, t2)

    inter, sum_o, sum_t, sum_bce = sums[0], sums[1], sums[2], sums[3]
    dice = 1.0 - (2.0 * inter + SMOOTH) / (sum_o + sum_t + SMOOTH)
    bce = sum_bce / jnp.float32(n)
    return dice + bce  # .mean() of a scalar is the scalar itself


def _reference_mixed_loss(output, target):
    o = output.reshape(-1).astype(jnp.float32)
    t = target.reshape(-1).astype(jnp.float32)
    inter = jnp.sum(o * t)
    dice = 1.0 - (2.0 * inter + SMOOTH) / (jnp.sum(o) + jnp.sum(t) + SMOOTH)
    log_o = jnp.maximum(jnp.log(o), -100.0)
    log_1mo = jnp.maximum(jnp.log(1.0 - o), -100.0)
    bce = jnp.mean(-(t * log_o + (1.0 - t) * log_1mo))
    return dice + bce


if __name__ == "__main__":
    key = jax.random.PRNGKey(0)
    k_o, k_t = jax.random.split(key)

    N, C, H, W = 2, 1, 16, 16
    # Model output: sigmoid probabilities in (0, 1), shape (N, H, W).
    output = jax.nn.sigmoid(jax.random.normal(k_o, (N, H, W), jnp.float32))
    # Target: binary mask with singleton channel dim, shape (N, 1, H, W) (NCHW).
    target = (jax.random.uniform(k_t, (N, C, H, W)) > 0.5).astype(jnp.float32)

    loss = mixed_loss(output, target)
    jax.block_until_ready(loss)

    ref = _reference_mixed_loss(output, target)
    assert jnp.allclose(loss, ref, rtol=1e-5, atol=1e-5), (loss, ref)

    print("KERNEL_OK")
</pallas_src>

<mosaic_0001>
module attributes {stable_mosaic.version = 11 : i64} {
  func.func @kernel(%arg0: i32, %arg1: memref<32x128xf32, #tpu.memory_space<vmem>>, %arg2: memref<32x128xf32, #tpu.memory_space<vmem>>, %arg3: memref<4xf32, #tpu.memory_space<smem>>, %arg4: memref<4x8x128xf32, #tpu.memory_space<vmem>>) attributes {dimension_semantics = [#tpu.dimension_semantics<arbitrary>], iteration_bounds = array<i64: 1>, scalar_prefetch = 0 : i64, scratch_operands = 1 : i64, tpu.core_type = #tpu.core_type<tc>, window_params = [{transform_indices = @transform_0, window_bounds = array<i64: 32, 128>}, {transform_indices = @transform_1, window_bounds = array<i64: 32, 128>}, {transform_indices = @transform_2, window_bounds = array<i64: 4>}]} {
    %c0_i32 = arith.constant 0 : i32
    %0 = arith.cmpi eq, %arg0, %c0_i32 : i32
    %1 = arith.extui %0 : i1 to i32
    %c0_i32_0 = arith.constant 0 : i32
    %2 = arith.cmpi ne, %1, %c0_i32_0 : i32
    scf.if %2 {
      %cst_47 = arith.constant 0.000000e+00 : f32
      %119 = vector.broadcast %cst_47 : f32 to vector<4x8x128xf32>
      %c0_48 = arith.constant 0 : index
      %c0_49 = arith.constant 0 : index
      %c0_50 = arith.constant 0 : index
      %120 = vector.load %arg4[%c0_48, %c0_49, %c0_50] : memref<4x8x128xf32, #tpu.memory_space<vmem>>, vector<4x8x128xf32>
      tpu.vector_store %arg4[%c0_48, %c0_49, %c0_50], %119 {strides = array<i32>} : memref<4x8x128xf32, #tpu.memory_space<vmem>>, vector<4x8x128xf32>,
    } else {
    }
    %cst = arith.constant 0.000000e+00 : f32
    %3 = vector.broadcast %cst : f32 to vector<8x128xf32>
    %c0_i32_1 = arith.constant 0 : i32
    %c8_i32 = arith.constant 8 : i32
    %4 = arith.muli %c0_i32_1, %c8_i32 : i32
    %5 = tpu.assume_multiple %4, 8 : i32
    %6 = arith.index_cast %5 : i32 to index
    %c0 = arith.constant 0 : index
    %7 = vector.load %arg1[%6, %c0] : memref<32x128xf32, #tpu.memory_space<vmem>>, vector<8x128xf32>
    %8 = arith.index_cast %5 : i32 to index
    %c0_2 = arith.constant 0 : index
    %9 = vector.load %arg2[%8, %c0_2] : memref<32x128xf32, #tpu.memory_space<vmem>>, vector<8x128xf32>
    %10 = math.log %7 : vector<8x128xf32>
    %cst_3 = arith.constant -1.000000e+02 : f32
    %11 = vector.broadcast %cst_3 : f32 to vector<8x128xf32>
    %12 = arith.maximumf %10, %11 : vector<8x128xf32>
    %cst_4 = arith.constant 1.000000e+00 : f32
    %13 = vector.broadcast %cst_4 : f32 to vector<8x128xf32>
    %14 = arith.subf %13, %7 : vector<8x128xf32>
    %15 = math.log %14 : vector<8x128xf32>
    %cst_5 = arith.constant -1.000000e+02 : f32
    %16 = vector.broadcast %cst_5 : f32 to vector<8x128xf32>
    %17 = arith.maximumf %15, %16 : vector<8x128xf32>
    %18 = arith.subf %17, %12 : vector<8x128xf32>
    %19 = arith.mulf %9, %18 : vector<8x128xf32>
    %20 = arith.subf %19, %17 : vector<8x128xf32>
    %21 = arith.mulf %7, %9 : vector<8x128xf32>
    %22 = arith.addf %3, %21 : vector<8x128xf32>
    %23 = arith.addf %3, %7 : vector<8x128xf32>
    %24 = arith.addf %3, %9 : vector<8x128xf32>
    %25 = arith.addf %3, %20 : vector<8x128xf32>
    %c1_i32 = arith.constant 1 : i32
    %c8_i32_6 = arith.constant 8 : i32
    %26 = arith.muli %c1_i32, %c8_i32_6 : i32
    %27 = tpu.assume_multiple %26, 8 : i32
    %28 = arith.index_cast %27 : i32 to index
    %c0_7 = arith.constant 0 : index
    %29 = vector.load %arg1[%28, %c0_7] : memref<32x128xf32, #tpu.memory_space<vmem>>, vector<8x128xf32>
    %30 = arith.index_cast %27 : i32 to index
    %c0_8 = arith.constant 0 : index
    %31 = vector.load %arg2[%30, %c0_8] : memref<32x128xf32, #tpu.memory_space<vmem>>, vector<8x128xf32>
    %32 = math.log %29 : vector<8x128xf32>
    %cst_9 = arith.constant -1.000000e+02 : f32
    %33 = vector.broadcast %cst_9 : f32 to vector<8x128xf32>
    %34 = arith.maximumf %32, %33 : vector<8x128xf32>
    %cst_10 = arith.constant 1.000000e+00 : f32
    %35 = vector.broadcast %cst_10 : f32 to vector<8x128xf32>
    %36 = arith.subf %35, %29 : vector<8x128xf32>
    %37 = math.log %36 : vector<8x128xf32>
    %cst_11 = arith.constant -1.000000e+02 : f32
    %38 = vector.broadcast %cst_11 : f32 to vector<8x128xf32>
    %39 = arith.maximumf %37, %38 : vector<8x128xf32>
    %40 = arith.subf %39, %34 : vector<8x128xf32>
    %41 = arith.mulf %31, %40 : vector<8x128xf32>
    %42 = arith.subf %41, %39 : vector<8x128xf32>
    %43 = arith.mulf %29, %31 : vector<8x128xf32>
    %44 = arith.addf %22, %43 : vector<8x128xf32>
    %45 = arith.addf %23, %29 : vector<8x128xf32>
    %46 = arith.addf %24, %31 : vector<8x128xf32>
    %47 = arith.addf %25, %42 : vector<8x128xf32>
    %c2_i32 = arith.constant 2 : i32
    %c8_i32_12 = arith.constant 8 : i32
    %48 = arith.muli %c2_i32, %c8_i32_12 : i32
    %49 = tpu.assume_multiple %48, 8 : i32
    %50 = arith.index_cast %49 : i32 to index
    %c0_13 = arith.constant 0 : index
    %51 = vector.load %arg1[%50, %c0_13] : memref<32x128xf32, #tpu.memory_space<vmem>>, vector<8x128xf32>
    %52 = arith.index_cast %49 : i32 to index
    %c0_14 = arith.constant 0 : index
    %53 = vector.load %arg2[%52, %c0_14] : memref<32x128xf32, #tpu.memory_space<vmem>>, vector<8x128xf32>
    %54 = math.log %51 : vector<8x128xf32>
    %cst_15 = arith.constant -1.000000e+02 : f32
    %55 = vector.broadcast %cst_15 : f32 to vector<8x128xf32>
    %56 = arith.maximumf %54, %55 : vector<8x128xf32>
    %cst_16 = arith.constant 1.000000e+00 : f32
    %57 = vector.broadcast %cst_16 : f32 to vector<8x128xf32>
    %58 = arith.subf %57, %51 : vector<8x128xf32>
    %59 = math.log %58 : vector<8x128xf32>
    %cst_17 = arith.constant -1.000000e+02 : f32
    %60 = vector.broadcast %cst_17 : f32 to vector<8x128xf32>
    %61 = arith.maximumf %59, %60 : vector<8x128xf32>
    %62 = arith.subf %61, %56 : vector<8x128xf32>
    %63 = arith.mulf %53, %62 : vector<8x128xf32>
    %64 = arith.subf %63, %61 : vector<8x128xf32>
    %65 = arith.mulf %51, %53 : vector<8x128xf32>
    %66 = arith.addf %44, %65 : vector<8x128xf32>
    %67 = arith.addf %45, %51 : vector<8x128xf32>
    %68 = arith.addf %46, %53 : vector<8x128xf32>
    %69 = arith.addf %47, %64 : vector<8x128xf32>
    %c3_i32 = arith.constant 3 : i32
    %c8_i32_18 = arith.constant 8 : i32
    %70 = arith.muli %c3_i32, %c8_i32_18 : i32
    %71 = tpu.assume_multiple %70, 8 : i32
    %72 = arith.index_cast %71 : i32 to index
    %c0_19 = arith.constant 0 : index
    %73 = vector.load %arg1[%72, %c0_19] : memref<32x128xf32, #tpu.memory_space<vmem>>, vector<8x128xf32>
    %74 = arith.index_cast %71 : i32 to index
    %c0_20 = arith.constant 0 : index
    %75 = vector.load %arg2[%74, %c0_20] : memref<32x128xf32, #tpu.memory_space<vmem>>, vector<8x128xf32>
    %76 = math.log %73 : vector<8x128xf32>
    %cst_21 = arith.constant -1.000000e+02 : f32
    %77 = vector.broadcast %cst_21 : f32 to vector<8x128xf32>
    %78 = arith.maximumf %76, %77 : vector<8x128xf32>
    %cst_22 = arith.constant 1.000000e+00 : f32
    %79 = vector.broadcast %cst_22 : f32 to vector<8x128xf32>
    %80 = arith.subf %79, %73 : vector<8x128xf32>
    %81 = math.log %80 : vector<8x128xf32>
    %cst_23 = arith.constant -1.000000e+02 : f32
    %82 = vector.broadcast %cst_23 : f32 to vector<8x128xf32>
    %83 = arith.maximumf %81, %82 : vector<8x128xf32>
    %84 = arith.subf %83, %78 : vector<8x128xf32>
    %85 = arith.mulf %75, %84 : vector<8x128xf32>
    %86 = arith.subf %85, %83 : vector<8x128xf32>
    %87 = arith.mulf %73, %75 : vector<8x128xf32>
    %88 = arith.addf %66, %87 : vector<8x128xf32>
    %89 = arith.addf %67, %73 : vector<8x128xf32>
    %90 = arith.addf %68, %75 : vector<8x128xf32>
    %91 = arith.addf %69, %86 : vector<8x128xf32>
    %c4_i32 = arith.constant 4 : i32
    %c0_24 = arith.constant 0 : index
    %c0_25 = arith.constant 0 : index
    %c0_26 = arith.constant 0 : index
    %92 = vector.load %arg4[%c0_24, %c0_25, %c0_26] : memref<4x8x128xf32, #tpu.memory_space<vmem>>, vector<1x8x128xf32>
    %93 = vector.shape_cast %92 : vector<1x8x128xf32> to vector<8x128xf32>
    %94 = arith.addf %93, %88 : vector<8x128xf32>
    %c0_27 = arith.constant 0 : index
    %c0_28 = arith.constant 0 : index
    %c0_29 = arith.constant 0 : index
    %95 = vector.load %arg4[%c0_27, %c0_28, %c0_29] : memref<4x8x128xf32, #tpu.memory_space<vmem>>, vector<1x8x128xf32>
    %96 = vector.shape_cast %95 : vector<1x8x128xf32> to vector<8x128xf32>
    %97 = vector.shape_cast %94 : vector<8x128xf32> to vector<1x8x128xf32>
    tpu.vector_store %arg4[%c0_27, %c0_28, %c0_29], %97 {strides = array<i32>} : memref<4x8x128xf32, #tpu.memory_space<vmem>>, vector<1x8x128xf32>,
    %c1 = arith.constant 1 : index
    %c0_30 = arith.constant 0 : index
    %c0_31 = arith.constant 0 : index
    %98 = vector.load %arg4[%c1, %c0_30, %c0_31] : memref<4x8x128xf32, #tpu.memory_space<vmem>>, vector<1x8x128xf32>
    %99 = vector.shape_cast %98 : vector<1x8x128xf32> to vector<8x128xf32>
    %100 = arith.addf %99, %89 : vector<8x128xf32>
    %c1_32 = arith.constant 1 : index
    %c0_33 = arith.constant 0 : index
    %c0_34 = arith.constant 0 : index
    %101 = vector.load %arg4[%c1_32, %c0_33, %c0_34] : memref<4x8x128xf32, #tpu.memory_space<vmem>>, vector<1x8x128xf32>
    %102 = vector.shape_cast %101 : vector<1x8x128xf32> to vector<8x128xf32>
    %103 = vector.shape_cast %100 : vector<8x128xf32> to vector<1x8x128xf32>
    tpu.vector_store %arg4[%c1_32, %c0_33, %c0_34], %103 {strides = array<i32>} : memref<4x8x128xf32, #tpu.memory_space<vmem>>, vector<1x8x128xf32>,
    %c2 = arith.constant 2 : index
    %c0_35 = arith.constant 0 : index
    %c0_36 = arith.constant 0 : index
    %104 = vector.load %arg4[%c2, %c0_35, %c0_36] : memref<4x8x128xf32, #tpu.memory_space<vmem>>, vector<1x8x128xf32>
    %105 = vector.shape_cast %104 : vector<1x8x128xf32> to vector<8x128xf32>
    %106 = arith.addf %105, %90 : vector<8x128xf32>
    %c2_37 = arith.constant 2 : index
    %c0_38 = arith.constant 0 : index
    %c0_39 = arith.constant 0 : index
    %107 = vector.load %arg4[%c2_37, %c0_38, %c0_39] : memref<4x8x128xf32, #tpu.memory_space<vmem>>, vector<1x8x128xf32>
    %108 = vector.shape_cast %107 : vector<1x8x128xf32> to vector<8x128xf32>
    %109 = vector.shape_cast %106 : vector<8x128xf32> to vector<1x8x128xf32>
    tpu.vector_store %arg4[%c2_37, %c0_38, %c0_39], %109 {strides = array<i32>} : memref<4x8x128xf32, #tpu.memory_space<vmem>>, vector<1x8x128xf32>,
    %c3 = arith.constant 3 : index
    %c0_40 = arith.constant 0 : index
    %c0_41 = arith.constant 0 : index
    %110 = vector.load %arg4[%c3, %c0_40, %c0_41] : memref<4x8x128xf32, #tpu.memory_space<vmem>>, vector<1x8x128xf32>
    %111 = vector.shape_cast %110 : vector<1x8x128xf32> to vector<8x128xf32>
    %112 = arith.addf %111, %91 : vector<8x128xf32>
    %c3_42 = arith.constant 3 : index
    %c0_43 = arith.constant 0 : index
    %c0_44 = arith.constant 0 : index
    %113 = vector.load %arg4[%c3_42, %c0_43, %c0_44] : memref<4x8x128xf32, #tpu.memory_space<vmem>>, vector<1x8x128xf32>
    %114 = vector.shape_cast %113 : vector<1x8x128xf32> to vector<8x128xf32>
    %115 = vector.shape_cast %112 : vector<8x128xf32> to vector<1x8x128xf32>
    tpu.vector_store %arg4[%c3_42, %c0_43, %c0_44], %115 {strides = array<i32>} : memref<4x8x128xf32, #tpu.memory_space<vmem>>, vector<1x8x128xf32>,
    %c0_i32_45 = arith.constant 0 : i32
    %116 = arith.cmpi eq, %arg0, %c0_i32_45 : i32
    %117 = arith.extui %116 : i1 to i32
    %c0_i32_46 = arith.constant 0 : i32
    %118 = arith.cmpi ne, %117, %c0_i32_46 : i32
    scf.if %118 {
      %c0_47 = arith.constant 0 : index
      %c0_48 = arith.constant 0 : index
      %c0_49 = arith.constant 0 : index
      %119 = vector.load %arg4[%c0_47, %c0_48, %c0_49] : memref<4x8x128xf32, #tpu.memory_space<vmem>>, vector<1x8x128xf32>
      %120 = vector.shape_cast %119 : vector<1x8x128xf32> to vector<8x128xf32>
      %121 = vector.shape_cast %120 : vector<8x128xf32> to vector<1x8x128xf32>
      %cst_50 = arith.constant dense<0.000000e+00> : vector<1xf32>
      %122 = vector.multi_reduction <add>, %121, %cst_50 [1, 2] : vector<1x8x128xf32> to vector<1xf32>
      %123 = vector.shape_cast %122 : vector<1xf32> to vector<1x1x1xf32>
      %124 = vector.extract %123[0, 0, 0] : f32 from vector<1x1x1xf32>
      %c0_51 = arith.constant 0 : index
      %125 = memref.load %arg3[%c0_51] : memref<4xf32, #tpu.memory_space<smem>>
      memref.store %124, %arg3[%c0_51] : memref<4xf32, #tpu.memory_space<smem>>
      %c1_52 = arith.constant 1 : index
      %c0_53 = arith.constant 0 : index
      %c0_54 = arith.constant 0 : index
      %126 = vector.load %arg4[%c1_52, %c0_53, %c0_54] : memref<4x8x128xf32, #tpu.memory_space<vmem>>, vector<1x8x128xf32>
      %127 = vector.shape_cast %126 : vector<1x8x128xf32> to vector<8x128xf32>
      %128 = vector.shape_cast %127 : vector<8x128xf32> to vector<1x8x128xf32>
      %cst_55 = arith.constant dense<0.000000e+00> : vector<1xf32>
      %129 = vector.multi_reduction <add>, %128, %cst_55 [1, 2] : vector<1x8x128xf32> to vector<1xf32>
      %130 = vector.shape_cast %129 : vector<1xf32> to vector<1x1x1xf32>
      %131 = vector.extract %130[0, 0, 0] : f32 from vector<1x1x1xf32>
      %c1_56 = arith.constant 1 : index
      %132 = memref.load %arg3[%c1_56] : memref<4xf32, #tpu.memory_space<smem>>
      memref.store %131, %arg3[%c1_56] : memref<4xf32, #tpu.memory_space<smem>>
      %c2_57 = arith.constant 2 : index
      %c0_58 = arith.constant 0 : index
      %c0_59 = arith.constant 0 : index
      %133 = vector.load %arg4[%c2_57, %c0_58, %c0_59] : memref<4x8x128xf32, #tpu.memory_space<vmem>>, vector<1x8x128xf32>
      %134 = vector.shape_cast %133 : vector<1x8x128xf32> to vector<8x128xf32>
      %135 = vector.shape_cast %134 : vector<8x128xf32> to vector<1x8x128xf32>
      %cst_60 = arith.constant dense<0.000000e+00> : vector<1xf32>
      %136 = vector.multi_reduction <add>, %135, %cst_60 [1, 2] : vector<1x8x128xf32> to vector<1xf32>
      %137 = vector.shape_cast %136 : vector<1xf32> to vector<1x1x1xf32>
      %138 = vector.extract %137[0, 0, 0] : f32 from vector<1x1x1xf32>
      %c2_61 = arith.constant 2 : index
      %139 = memref.load %arg3[%c2_61] : memref<4xf32, #tpu.memory_space<smem>>
      memref.store %138, %arg3[%c2_61] : memref<4xf32, #tpu.memory_space<smem>>
      %c3_62 = arith.constant 3 : index
      %c0_63 = arith.constant 0 : index
      %c0_64 = arith.constant 0 : index
      %140 = vector.load %arg4[%c3_62, %c0_63, %c0_64] : memref<4x8x128xf32, #tpu.memory_space<vmem>>, vector<1x8x128xf32>
      %141 = vector.shape_cast %140 : vector<1x8x128xf32> to vector<8x128xf32>
      %142 = vector.shape_cast %141 : vector<8x128xf32> to vector<1x8x128xf32>
      %cst_65 = arith.constant dense<0.000000e+00> : vector<1xf32>
      %143 = vector.multi_reduction <add>, %142, %cst_65 [1, 2] : vector<1x8x128xf32> to vector<1xf32>
      %144 = vector.shape_cast %143 : vector<1xf32> to vector<1x1x1xf32>
      %145 = vector.extract %144[0, 0, 0] : f32 from vector<1x1x1xf32>
      %c3_66 = arith.constant 3 : index
      %146 = memref.load %arg3[%c3_66] : memref<4xf32, #tpu.memory_space<smem>>
      memref.store %145, %arg3[%c3_66] : memref<4xf32, #tpu.memory_space<smem>>
    } else {
    }
    return
  }
  func.func @transform_0(%arg0: i32) -> (i32, i32) {
    %c0_i32 = arith.constant 0 : i32
    %c0_i32_0 = arith.constant 0 : i32
    return %arg0, %c0_i32 : i32, i32
  }
  func.func @transform_1(%arg0: i32) -> (i32, i32) {
    %c0_i32 = arith.constant 0 : i32
    %c0_i32_0 = arith.constant 0 : i32
    return %arg0, %c0_i32 : i32, i32
  }
  func.func @transform_2(%arg0: i32) -> i32 {
    %c0_i32 = arith.constant 0 : i32
    %c0_i32_0 = arith.constant 0 : i32
    return %c0_i32 : i32
  }
}

</mosaic_0001>

<bundles_post_ra>
// kernel: tpu_custom_call.1
= control target key start
LH: loop header
LB: loop body
LE: loop exit
PB: predicated region body
PF: predicated region fallthrough
CT: control target
= control target key end

     0   :  { %7 = vsyncpa [#allocation4], 0  ;;  %s333_s0 = inlined_call_operand.hbm [shape: f32[32,128], index: 0, kind: input, shape index: {}]   ;;  %s334_s1 = inlined_call_operand.hbm [shape: f32[32,128], index: 1, kind: input, shape index: {}]   ;;  %s335_s2 = inlined_call_operand.hbm [shape: f32[4], index: 2, kind: output, shape index: {}]  }
   0x1   :  { %8 = vsyncpa [#allocation7], 0 }
   0x2   :  { %9 = vsyncpa [#allocation5], 0  ;;  %s14_s11 = sshll.u32 %s333_s0, 4  ;;  %s304_s12 = smov [#allocation3]   ;;  %s15_s11 = int_to_ptr.hbm [resolvable:$true] %s14_s11 }
   0x3   :  { %s16_s13 = sshll.u32 %s304_s12, 4  ;;  %s27_s16 = sshll.u32 %s334_s1, 4  ;;  %s17_s13 = int_to_ptr.vmem [resolvable:$true] %s16_s13  ;;  %s28_s16 = int_to_ptr.hbm [resolvable:$true] %s27_s16 }
   0x4   :  { %s305_s17 = smov 128   ;;  %s306_s18 = smov 8  }
   0x5   :  { %22 = dma.hbm_to_vmem [thread:$0]  %s15_s11, 512, %s17_s13, [#allocation4], %s305_s17, %s305_s17, %s306_s18  }
   0x6   :  { %s307_s19 = smov [#allocation6]  }
   0x7   :  { %s29_s20 = sshll.u32 %s307_s19, 4  ;;  %s30_s20 = int_to_ptr.vmem [resolvable:$true] %s29_s20 }
   0x8   :  { %35 = dma.hbm_to_vmem [thread:$0]  %s28_s16, 512, %s30_s20, [#allocation7], %s305_s17, %s305_s17, %s306_s18  }
   0x9   :  { %298 = dma.done.wait [#allocation4], 512  }
   0xa   :  { %299 = vsyncadd [#allocation4], 4294966784 }
   0xb   :  { %300 = dma.done.wait [#allocation7], 512  }
   0xc   :  { %301 = vsyncadd [#allocation7], 4294966784  ;;  %v52_v0 = vld [vmem:[#allocation3] sm:$0xff]  ;;  %v70_v2 = vld [vmem:[#allocation3 + $0x8] sm:$0xff]  ;;  %s197_s24 = sshll.u32 %s335_s2, 4  ;;  %s308_s26 = smov [#allocation8]   ;;  %s198_s24 = int_to_ptr.hbm [resolvable:$true] %s197_s24 }
   0xd   :  { %v53_v1 = vld [vmem:[#allocation6] sm:$0xff]  ;;  %v72_v4 = vld [vmem:[#allocation6 + $0x8] sm:$0xff]  ;;  %222 = vlog2.f32 %v70_v2  ;;  %v89_v5 = vld [vmem:[#allocation3 + $0x10] sm:$0xff]  ;;  %v57_v7 = vsub.f32 1.0, %v52_v0  ;;  %v76_v14 = vsub.f32 1.0, %v70_v2  ;;  %v85_v21 = vadd.f32 %v70_v2, %v52_v0 }
   0xe   :  { %v64_v3 = vmul.f32 %v53_v1, %v52_v0  ;;  %v91_v6 = vld [vmem:[#allocation6 + $0x10] sm:$0xff]  ;;  %v83_v8 = vmul.f32 %v72_v4, %v70_v2  ;;  %224 = vlog2.f32 %v89_v5  ;;  %v108_v10 = vld [vmem:[#allocation3 + $0x18] sm:$0xff]  ;;  %v86_v12 = vadd.f32 %v72_v4, %v53_v1 }
   0xf   :  { %v102_v9 = vmul.f32 %v91_v6, %v89_v5  ;;  %v110_v11 = vld [vmem:[#allocation6 + $0x18] sm:$0xff]  ;;  %226 = vlog2.f32 %v108_v10  ;;  %v95_v17 = vsub.f32 1.0, %v89_v5  ;;  %v114_v18 = vsub.f32 1.0, %v108_v10 }
  0x10   :  { %v121_v13 = vmul.f32 %v110_v11, %v108_v10  ;;  %v84_v15 = vadd.f32 %v83_v8, %v64_v3  ;;  %228 = vlog2.f32 %v52_v0  ;;  %v105_v16 = vadd.f32 %v91_v6, %v86_v12 }
  0x11   :  { %230 = vlog2.f32 %v57_v7  ;;  %v104_v28 = vadd.f32 %v89_v5, %v85_v21 }
  0x12   :  { %v103_v19 = vadd.f32 %v102_v9, %v84_v15  ;;  %v124_v20 = vadd.f32 %v110_v11, %v105_v16  ;;  %232 = vlog2.f32 %v76_v14 }
  0x13   :  { %v223_v22 = vpop.eup %222  ;;  %234 = vlog2.f32 %v95_v17  ;;  %v123_v40 = vadd.f32 %v108_v10, %v104_v28 }
  0x14   :  { %v225_v23 = vpop.eup %224  ;;  %v122_v24 = vadd.f32 %v121_v13, %v103_v19  ;;  %169 = vadd.xlane.f32.xlu1 %v124_v20  ;;  %236 = vlog2.f32 %v114_v18  ;;  %v74_v26 = vmul.f32 0.6931472, %v223_v22 }
  0x15   :  { %v227_v25 = vpop.eup %226  ;;  %v93_v29 = vmul.f32 0.6931472, %v225_v23 }
  0x16   :  { %v229_v27 = vpop.eup %228  ;;  %145 = vadd.xlane.f32.xlu0 %v122_v24  ;;  %v112_v32 = vmul.f32 0.6931472, %v227_v25  ;;  %v75_v37 = vmax.f32 %v74_v26, -100.0 }
  0x17   :  { %v231_v30 = vpop.eup %230  ;;  %v55_v31 = vmul.f32 0.6931472, %v229_v27  ;;  %v94_v42 = vmax.f32 %v93_v29, -100.0 }
  0x18   :  { %v233_v33 = vpop.eup %232  ;;  %v59_v34 = vmul.f32 0.6931472, %v231_v30  ;;  %v113_v45 = vmax.f32 %v112_v32, -100.0 }
  0x19   :  { %v235_v35 = vpop.eup %234  ;;  %v56_v36 = vmax.f32 %v55_v31, -100.0  ;;  %v78_v38 = vmul.f32 0.6931472, %v233_v33 }
  0x1a   :  { %v237_v39 = vpop.eup %236  ;;  %v60_v41 = vmax.f32 %v59_v34, -100.0  ;;  %v97_v43 = vmul.f32 0.6931472, %v235_v35 }
  0x1b   :  { %v79_v44 = vmax.f32 %v78_v38, -100.0  ;;  %v116_v46 = vmul.f32 0.6931472, %v237_v39 }
  0x1c   :  { %v61_v47 = vsub.f32 %v60_v41, %v56_v36  ;;  %v98_v48 = vmax.f32 %v97_v43, -100.0 }
  0x1d   :  { %v80_v49 = vsub.f32 %v79_v44, %v75_v37  ;;  %v117_v50 = vmax.f32 %v116_v46, -100.0 }
  0x1e   :  { %157 = vadd.xlane.f32.xlu0 %v123_v40  ;;  %v62_v51 = vmul.f32 %v61_v47, %v53_v1  ;;  %v99_v52 = vsub.f32 %v98_v48, %v94_v42 }
  0x1f   :  { %v81_v53 = vmul.f32 %v80_v49, %v72_v4  ;;  %v118_v54 = vsub.f32 %v117_v50, %v113_v45 }
  0x20   :  { %v63_v55 = vsub.f32 %v62_v51, %v60_v41  ;;  %v100_v56 = vmul.f32 %v99_v52, %v91_v6 }
  0x21   :  { %v82_v57 = vsub.f32 %v81_v53, %v79_v44  ;;  %v119_v58 = vmul.f32 %v118_v54, %v110_v11 }
  0x22   :  { %v101_v59 = vsub.f32 %v100_v56, %v98_v48 }
  0x23   :  { %v87_v60 = vadd.f32 %v82_v57, %v63_v55  ;;  %v120_v61 = vsub.f32 %v119_v58, %v117_v50 }
  0x25   :  { %v106_v62 = vadd.f32 %v101_v59, %v87_v60 }
  0x27   :  { %v125_v63 = vadd.f32 %v120_v61, %v106_v62 }
  0x29   :  { %181 = vadd.xlane.f32.xlu1 %v125_v63 }
  0x87   :  { %v170_v0 = vpop.xlane.xlu1 %169 }
  0x88   :  { %v171_v3 = vrot.slane %v170_v0, 4 }
  0x89   :  { %v146_v2 = vpop.xlane.xlu0 %145 }
  0x8a   :  { %v147_v5 = vrot.slane %v146_v2, 4  ;;  %v172_v8 = vadd.f32 %v171_v3, %v170_v0 }
  0x8c   :  { %v148_v7 = vadd.f32 %v147_v5, %v146_v2  ;;  %v173_v4 = vrot.slane %v172_v8, 2 }
  0x8e   :  { %v149_v1 = vrot.slane %v148_v7, 2  ;;  %v174_v14 = vadd.f32 %v173_v4, %v172_v8 }
  0x90   :  { %v150_v9 = vadd.f32 %v149_v1, %v148_v7  ;;  %v175_v17 = vrot.slane %v174_v14, 1 }
  0x91   :  { %v158_v10 = vpop.xlane.xlu0 %157 }
  0x92   :  { %v159_v12 = vrot.slane %v158_v10, 4  ;;  %v151_v6 = vrot.slane %v150_v9, 1  ;;  %v176_v22 = vadd.f32 %v175_v17, %v174_v14 }
  0x94   :  { %v160_v13 = vadd.f32 %v159_v12, %v158_v10  ;;  %v152_v11 = vadd.f32 %v151_v6, %v150_v9 }
  0x96   :  { %v161_v15 = vrot.slane %v160_v13, 2  ;;  %209 = vpush %v152_v11 }
  0x98   :  { %v162_v16 = vadd.f32 %v161_v15, %v160_v13 }
  0x9a   :  { %v163_v18 = vrot.slane %v162_v16, 1 }
  0x9c   :  { %v182_v19 = vpop.xlane.xlu1 %181  ;;  %v164_v20 = vadd.f32 %v163_v18, %v162_v16 }
  0x9d   :  { %v183_v21 = vrot.slane %v182_v19, 4 }
  0x9e   :  { %211 = vpush %v164_v20 }
  0x9f   :  { %v184_v23 = vadd.f32 %v183_v21, %v182_v19  ;;  %213 = vpush %v176_v22 }
  0xa1   :  { %v185_v24 = vrot.slane %v184_v23, 2 }
  0xa3   :  { %v186_v25 = vadd.f32 %v185_v24, %v184_v23 }
  0xa5   :  { %v187_v26 = vrot.slane %v186_v25, 1 }
  0xa7   :  { %v188_v27 = vadd.f32 %v187_v26, %v186_v25 }
  0xa9   :  { %215 = vpush %v188_v27 }
  0xc7   :  { %s210_s0 = spop %209 }
  0xc8   :  { %155 = sst [smem:[#allocation8]] %s210_s0 }
  0xcf   :  { %s212_s1 = spop %211 }
  0xd0   :  { %167 = sst [smem:[#allocation8 + $0x1]] %s212_s1  ;;  %s214_s21 = spop %213 }
  0xd1   :  { %179 = sst [smem:[#allocation8 + $0x2]] %s214_s21 }
  0xda   :  { %s216_s25 = spop %215 }
  0xdb   :  { %191 = sst [smem:[#allocation8 + $0x3]] %s216_s25 }
  0xdc   :  { %200 = dma.smem_to_hbm %s308_s26, 16, %s198_s24, [#allocation5]  }
  0xdd   :  { %302 = dma.done.wait [#allocation5], 16  }
  0xde   :  { %303 = vsyncadd [#allocation5], 4294967280 }
  0xdf   :  { %205 = sfence }
  0xe0   :  { %206 = vsyncpa [#allocation4], 1 }
  0xe1   :  { %207 = vsyncpa [#allocation7], 1 }
  0xe2   :  { %208 = vsyncpa [#allocation5], 1 }

</bundles_post_ra>
